<compile_context>
chip_gen: v7x
topology: tpu7x:2x2x1
jax: 0.10.0
libtpu: 0.0.40
codegen_flags: <defaults>
</compile_context>

<pallas_src>
import jax
import jax.numpy as jnp
from jax.experimental import pallas as pl
from jax.experimental.pallas import tpu as pltpu

HIDDEN = 128          # fixed by the module (Linear(state_dim, 128))
LANES = 128
NEG_MASK = -1e30      # bias value for padded action columns (exp -> 0)


def _round_up(x, m):
    return -(-x // m) * m


def _cdiv(a, b):
    return -(-a // b)


def actor_kernel(x_ref, w1_ref, b_ref, w2_ref, out_ref):
    # x_ref : (TB, S)      f32  raw input (cast to bf16 here, not in XLA)
    # w1_ref: (S, 128)     bf16
    # b_ref : (2, N)       f32  row 0 = b1 (zero-padded), row 1 = b2 (-1e30 pad)
    # w2_ref: (128, N)     bf16 zero-padded columns, N = round_up(A, 128)
    # out_ref:(TB, A)      f32  narrow output, only real action columns stored

    # Linear1 + ReLU (bf16 MXU matmul, f32 accumulation)
    x = x_ref[...].astype(jnp.bfloat16)
    h = jnp.dot(x, w1_ref[...], preferred_element_type=jnp.float32)
    h = jnp.maximum(h + b_ref[0:1, :HIDDEN], 0.0)

    # Linear2 (bf16 MXU matmul, f32 accumulation), lane-dense 128-wide logits
    logits = jnp.dot(h.astype(jnp.bfloat16), w2_ref[...],
                     preferred_element_type=jnp.float32)
    logits = logits + b_ref[1:2, :]          # padded cols get -1e30 -> exp == 0

    # softmax over the (padded) action axis; padded columns contribute 0 mass
    m = jnp.max(logits, axis=-1, keepdims=True)
    e = jnp.exp(logits - m)
    denom = jnp.sum(e, axis=-1, keepdims=True)
    probs = e * pl.reciprocal(denom, approx=False)   # exact: rows sum to 1

    # Store only the real action columns (narrow, masked vst).
    a = out_ref.shape[-1]
    out_ref[...] = probs[:, :a].astype(out_ref.dtype)


def actor_forward(x, w1, b1, w2, b2, *, batch_tile=1024, min_grid_steps=4,
                  out_dtype=jnp.float32):
    """x: (B, state_dim) f32 -> action probabilities (B, action_dim)."""
    B, S = x.shape
    H = w1.shape[1]
    A = w2.shape[1]
    assert H == HIDDEN, "module fixes the hidden width at 128"
    assert batch_tile % 8 == 0 and batch_tile >= 8

    N = _round_up(A, LANES)      # lane-dense width for logits / w2 / b2
    assert N >= HIDDEN, "fused (2,N) bias layout assumes N >= HIDDEN"

    # Only the tiny weights are padded/cast in the wrapper; x stays raw f32.
    w1_b = w1.astype(jnp.bfloat16)                                   # (S, 128)
    w2_p = jnp.pad(w2, ((0, 0), (0, N - A))).astype(jnp.bfloat16)    # (128, N)
    b1_p = jnp.pad(b1, ((0, 0), (0, N - H)))                         # (1, N)
    b2_p = jnp.pad(b2, ((0, 0), (0, N - A)), constant_values=NEG_MASK)
    b_stack = jnp.concatenate([b1_p, b2_p], axis=0).astype(jnp.float32)  # (2, N)

    if B <= batch_tile:
        # Single-shot: whole arrays resident in VMEM, no grid / pipeline
        # machinery, narrow (B, A) output.
        return pl.pallas_call(
            actor_kernel,
            out_shape=jax.ShapeDtypeStruct((B, A), out_dtype),
            in_specs=[pl.BlockSpec(memory_space=pltpu.MemorySpace.VMEM)] * 4,
            out_specs=pl.BlockSpec(memory_space=pltpu.MemorySpace.VMEM),
        )(x, w1_b, b_stack, w2_p)

    # Batch-tiled path: parallel batch axis (megacore / 2 TCs on v7x), weights
    # and biases stay resident (constant index_map), x/out tiles pipelined.
    TB = batch_tile
    while TB > 128 and _cdiv(B, TB) < min_grid_steps:
        TB //= 2                 # keep enough grid steps for the 2-TC split
    Bp = _round_up(B, TB)
    x_p = jnp.pad(x, ((0, Bp - B), (0, 0))) if Bp != B else x

    out = pl.pallas_call(
        actor_kernel,
        out_shape=jax.ShapeDtypeStruct((Bp, A), out_dtype),
        grid=(Bp // TB,),
        in_specs=[
            pl.BlockSpec((TB, S), lambda i: (i, 0)),        # raw f32 x tiles
            pl.BlockSpec((S, HIDDEN), lambda i: (0, 0)),    # resident weights
            pl.BlockSpec((2, N), lambda i: (0, 0)),
            pl.BlockSpec((HIDDEN, N), lambda i: (0, 0)),
        ],
        out_specs=pl.BlockSpec((TB, A), lambda i: (i, 0)),  # narrow output
        compiler_params=pltpu.CompilerParams(
            dimension_semantics=("parallel",),
            vmem_limit_bytes=32 * 1024 * 1024,  # ~ a few MiB used even at TB=4096
        ),
    )(x_p, w1_b, b_stack, w2_p)
    return out[:B] if Bp != B else out


def init_actor_params(key, state_dim, action_dim, hidden=HIDDEN):
    """nn.Linear-style U(-1/sqrt(fan_in), 1/sqrt(fan_in)) init.

    Weights are stored transposed relative to PyTorch ((in, out) instead of
    (out, in)) so the kernel computes x @ W directly.
    """
    k1, k2, k3, k4 = jax.random.split(key, 4)
    lim1 = 1.0 / jnp.sqrt(jnp.float32(state_dim))
    lim2 = 1.0 / jnp.sqrt(jnp.float32(hidden))
    w1 = jax.random.uniform(k1, (state_dim, hidden), jnp.float32, -lim1, lim1)
    b1 = jax.random.uniform(k2, (1, hidden), jnp.float32, -lim1, lim1)
    w2 = jax.random.uniform(k3, (hidden, action_dim), jnp.float32, -lim2, lim2)
    b2 = jax.random.uniform(k4, (1, action_dim), jnp.float32, -lim2, lim2)
    return w1, b1, w2, b2


def actor_reference(x, w1, b1, w2, b2):
    """Plain-JAX reference replicating the kernel's numeric path
    (bf16-quantized MXU operands, f32 accumulation)."""
    x_q = x.astype(jnp.bfloat16).astype(jnp.float32)
    w1_q = w1.astype(jnp.bfloat16).astype(jnp.float32)
    w2_q = w2.astype(jnp.bfloat16).astype(jnp.float32)
    h = jnp.maximum(x_q @ w1_q + b1, 0.0)
    h_q = h.astype(jnp.bfloat16).astype(jnp.float32)
    logits = h_q @ w2_q + b2
    return jax.nn.softmax(logits, axis=-1)


if __name__ == "__main__":
    state_dim = 32
    action_dim = 8

    key = jax.random.PRNGKey(0)
    kx, kp, kx2 = jax.random.split(key, 3)
    w1, b1, w2, b2 = init_actor_params(kp, state_dim, action_dim)

    # 1) Small batch -> single-shot (no-grid) path, narrow output.
    x_small = jax.random.normal(kx, (8, state_dim), jnp.float32)
    probs_small = jax.block_until_ready(actor_forward(x_small, w1, b1, w2, b2))
    ref_small = actor_reference(x_small, w1, b1, w2, b2)
    assert probs_small.shape == (8, action_dim)
    assert jnp.allclose(probs_small, ref_small, atol=5e-3, rtol=5e-3)
    assert jnp.allclose(jnp.sum(probs_small, axis=-1), 1.0, atol=1e-3)

    # 2) Larger batch -> batch-tiled path (parallel grid axis, TB auto-halved
    #    to keep >= min_grid_steps steps, ragged last tile).
    x_big = jax.random.normal(kx2, (2500, state_dim), jnp.float32)
    probs_big = jax.block_until_ready(actor_forward(x_big, w1, b1, w2, b2))
    ref_big = actor_reference(x_big, w1, b1, w2, b2)
    assert probs_big.shape == (2500, action_dim)
    assert jnp.allclose(probs_big, ref_big, atol=5e-3, rtol=5e-3)
    assert jnp.allclose(jnp.sum(probs_big, axis=-1), 1.0, atol=1e-3)

    print("KERNEL_OK")
</pallas_src>

<mosaic_0001>
module attributes {stable_mosaic.version = 11 : i64} {
  func.func @actor_kernel(%arg0: memref<8x32xf32, #tpu.memory_space<vmem>>, %arg1: memref<32x128xbf16, #tpu.memory_space<vmem>>, %arg2: memref<2x128xf32, #tpu.memory_space<vmem>>, %arg3: memref<128x128xbf16, #tpu.memory_space<vmem>>, %arg4: memref<8x8xf32, #tpu.memory_space<vmem>>) attributes {dimension_semantics = [], scalar_prefetch = 0 : i64, scratch_operands = 0 : i64, tpu.core_type = #tpu.core_type<tc>} {
    %c0 = arith.constant 0 : index
    %c0_0 = arith.constant 0 : index
    %0 = vector.load %arg0[%c0, %c0_0] : memref<8x32xf32, #tpu.memory_space<vmem>>, vector<8x32xf32>
    %1 = arith.truncf %0 : vector<8x32xf32> to vector<8x32xbf16>
    %c0_1 = arith.constant 0 : index
    %c0_2 = arith.constant 0 : index
    %2 = vector.load %arg1[%c0_1, %c0_2] : memref<32x128xbf16, #tpu.memory_space<vmem>>, vector<32x128xbf16>
    %cst = arith.constant dense<0.000000e+00> : vector<8x128xf32>
    %3 = tpu.matmul %1, %2, %cst {dimension_numbers = #tpu.dot_dimension_numbers<[1], [0], [0], [1], [0, 0, 1, 1], [], []>} : vector<8x32xbf16>, vector<32x128xbf16>, vector<8x128xf32> -> vector<8x128xf32>
    %c0_3 = arith.constant 0 : index
    %c0_4 = arith.constant 0 : index
    %4 = vector.load %arg2[%c0_3, %c0_4] : memref<2x128xf32, #tpu.memory_space<vmem>>, vector<1x128xf32>
    %5 = vector.broadcast %4 : vector<1x128xf32> to vector<8x128xf32>
    %6 = arith.addf %3, %5 : vector<8x128xf32>
    %cst_5 = arith.constant 0.000000e+00 : f32
    %7 = vector.broadcast %cst_5 : f32 to vector<8x128xf32>
    %8 = arith.maximumf %6, %7 : vector<8x128xf32>
    %9 = arith.truncf %8 : vector<8x128xf32> to vector<8x128xbf16>
    %c0_6 = arith.constant 0 : index
    %c0_7 = arith.constant 0 : index
    %10 = vector.load %arg3[%c0_6, %c0_7] : memref<128x128xbf16, #tpu.memory_space<vmem>>, vector<128x128xbf16>
    %cst_8 = arith.constant dense<0.000000e+00> : vector<8x128xf32>
    %11 = tpu.matmul %9, %10, %cst_8 {dimension_numbers = #tpu.dot_dimension_numbers<[1], [0], [0], [1], [0, 0, 1, 1], [], []>} : vector<8x128xbf16>, vector<128x128xbf16>, vector<8x128xf32> -> vector<8x128xf32>
    %c1 = arith.constant 1 : index
    %c0_9 = arith.constant 0 : index
    %12 = vector.load %arg2[%c1, %c0_9] : memref<2x128xf32, #tpu.memory_space<vmem>>, vector<1x128xf32>
    %13 = vector.broadcast %12 : vector<1x128xf32> to vector<8x128xf32>
    %14 = arith.addf %11, %13 : vector<8x128xf32>
    %cst_10 = arith.constant dense<0xFF800000> : vector<8xf32>
    %15 = vector.multi_reduction <maximumf>, %14, %cst_10 [1] : vector<8x128xf32> to vector<8xf32>
    %16 = vector.shape_cast %15 : vector<8xf32> to vector<8x1xf32>
    %17 = vector.broadcast %16 : vector<8x1xf32> to vector<8x128xf32>
    %18 = arith.subf %14, %17 : vector<8x128xf32>
    %19 = math.exp %18 : vector<8x128xf32>
    %cst_11 = arith.constant dense<0.000000e+00> : vector<8xf32>
    %20 = vector.multi_reduction <add>, %19, %cst_11 [1] : vector<8x128xf32> to vector<8xf32>
    %21 = vector.shape_cast %20 : vector<8xf32> to vector<8x1xf32>
    %22 = tpu.reciprocal %21 : vector<8x1xf32> -> vector<8x1xf32>
    %23 = vector.broadcast %22 : vector<8x1xf32> to vector<8x128xf32>
    %24 = arith.mulf %19, %23 : vector<8x128xf32>
    %25 = vector.extract_strided_slice %24 {offsets = [0, 0], sizes = [8, 8], strides = [1, 1]} : vector<8x128xf32> to vector<8x8xf32>
    %c0_12 = arith.constant 0 : index
    %c0_13 = arith.constant 0 : index
    %26 = vector.load %arg4[%c0_12, %c0_13] : memref<8x8xf32, #tpu.memory_space<vmem>>, vector<8x8xf32>
    tpu.vector_store %arg4[%c0_12, %c0_13], %25 {strides = array<i32>} : memref<8x8xf32, #tpu.memory_space<vmem>>, vector<8x8xf32>,
    return
  }
}

</mosaic_0001>

<bundles_post_ra>
// kernel: tpu_custom_call.1
= control target key start
LH: loop header
LB: loop body
LE: loop exit
PB: predicated region body
PF: predicated region fallthrough
CT: control target
= control target key end

     0   :  { %9 = vsyncpa [#allocation3], 0  ;;  %s525_s0 = inlined_call_operand.hbm [shape: f32[8,32], index: 0, kind: input, shape index: {}]   ;;  %s526_s1 = inlined_call_operand.hbm [shape: bf16[32,128], index: 1, kind: input, shape index: {}]   ;;  %s527_s2 = inlined_call_operand.vmem [shape: f32[2,128], index: 2, kind: input, shape index: {}]   ;;  %s528_s3 = inlined_call_operand.hbm [shape: bf16[128,128], index: 3, kind: input, shape index: {}]   ;;  %s529_s4 = inlined_call_operand.hbm [shape: f32[8,8], index: 4, kind: output, shape index: {}]  }
   0x1   :  { %10 = vsyncpa [#allocation6], 0 }
   0x2   :  { %11 = vsyncpa [#allocation4], 0  ;;  %s432_s15 = smov [#allocation5]   ;;  %s338_s19 = scalar_lea.hbm %s526_s1, 256 }
   0x3   :  { %s27_s16 = sshll.u32 %s432_s15, 4  ;;  %p339_p0 = scmp.ne.s32.totalorder %s526_s1, %s338_s19  ;;  %s28_s16 = int_to_ptr.vmem [resolvable:$true] %s27_s16 }
   0x4   :  { %p342_p1 = scmp.lt.u32.totalorder %s338_s19, %s526_s1 }
   0x6   :  { %p344_p2 = pnand %p342_p1, %p339_p0 }
   0x8   :  { %347 = shalt.err (!%p344_p2)
}
   0x9   :  { %s348_s24 = scalar_lea.vmem %s28_s16, 256  ;;  %p353_p4 = scmp.lt.s32.totalorder %s28_s16, %s28_s16 }
   0xa   :  { %p349_p3 = scmp.ne.s32.totalorder %s28_s16, %s348_s24  ;;  %p354_p5 = scmp.lt.s32.totalorder %s348_s24, %s348_s24 }
   0xc   :  { %p355_p6 = por %p354_p5, %p353_p4 }
   0xe   :  { %p356_p7 = pnand %p355_p6, %p349_p3 }
  0x10   :  { %359 = shalt.err (!%p356_p7)
}
  0x11   :  { %s433_s25 = smov 64   ;;  %s434_s26 = smov 4  }
  0x12   :  { %33 = dma.hbm_to_vmem [thread:$0]  %s526_s1, 256, %s28_s16, [#allocation6], %s433_s25, %s433_s25, %s434_s26  }
  0x13   :  { %s435_s29 = smov [#allocation2]   ;;  %s436_s5 = smov [#allocation7]  }
  0x14   :  { %s18_s30 = sshll.u32 %s435_s29, 4  ;;  %s41_s6 = sshll.u32 %s436_s5, 4  ;;  %s19_s30 = int_to_ptr.vmem [resolvable:$true] %s18_s30  ;;  %s42_s6 = int_to_ptr.vmem [resolvable:$true] %s41_s6 }
  0x15   :  { %s360_s9 = scalar_lea.hbm %s525_s0, 128 }
  0x16   :  { %p361_p8 = scmp.ne.s32.totalorder %s525_s0, %s360_s9  ;;  %p364_p9 = scmp.lt.u32.totalorder %s360_s9, %s525_s0 }
  0x18   :  { %p366_p10 = pnand %p364_p9, %p361_p8 }
  0x1a   :  { %369 = shalt.err (!%p366_p10)
}
  0x1b   :  { %s370_s1 = scalar_lea.vmem %s19_s30, 128  ;;  %p375_p12 = scmp.lt.s32.totalorder %s19_s30, %s19_s30 }
  0x1c   :  { %p371_p11 = scmp.ne.s32.totalorder %s19_s30, %s370_s1  ;;  %p376_p13 = scmp.lt.s32.totalorder %s370_s1, %s370_s1 }
  0x1e   :  { %p377_p0 = por %p376_p13, %p375_p12 }
  0x20   :  { %p378_p1 = pnand %p377_p0, %p371_p11 }
  0x22   :  { %381 = shalt.err (!%p378_p1)
}
  0x23   :  { %21 = dma.hbm_to_vmem [thread:$0]  %s525_s0, 128, %s19_s30, [#allocation3]  }
  0x24   :  { %s382_s18 = scalar_lea.hbm %s528_s3, 1024 }
  0x25   :  { %p383_p2 = scmp.ne.s32.totalorder %s528_s3, %s382_s18  ;;  %p386_p3 = scmp.lt.u32.totalorder %s382_s18, %s528_s3 }
  0x27   :  { %p388_p4 = pnand %p386_p3, %p383_p2 }
  0x29   :  { %391 = shalt.err (!%p388_p4)
}
  0x2a   :  { %s392_s23 = scalar_lea.vmem %s42_s6, 1024  ;;  %p397_p6 = scmp.lt.s32.totalorder %s42_s6, %s42_s6 }
  0x2b   :  { %p393_p5 = scmp.ne.s32.totalorder %s42_s6, %s392_s23  ;;  %p398_p7 = scmp.lt.s32.totalorder %s392_s23, %s392_s23 }
  0x2d   :  { %p399_p8 = por %p398_p7, %p397_p6 }
  0x2f   :  { %p400_p9 = pnand %p399_p8, %p393_p5 }
  0x31   :  { %403 = shalt.err (!%p400_p9)
}
  0x32   :  { %47 = dma.hbm_to_vmem [thread:$0]  %s528_s3, 1024, %s42_s6, [#allocation6], %s433_s25, %s433_s25, %s434_s26  }
  0x33   :  { %426 = dma.done.wait [#allocation3], 128  }
  0x34   :  { %427 = vsyncadd [#allocation3], 4294967168 }
  0x35   :  { %428 = dma.done.wait [#allocation6], 1280  }
  0x36   :  { %429 = vsyncadd [#allocation6], 4294966016  ;;  %v437_v0 = vmov 0.0   ;;  %vm438_vm0 = vmmov 0   ;;  %v324_v1 = vld [vmem:[#allocation5] sm:$0xff]   ;;  %v325_v2 = vld [vmem:[#allocation5 + $0x8] sm:$0xff]  }
  0x37   :  { %288 = vmatprep.subr.bf16.mxu0 %v437_v0  ;;  %292 = vmatprep.mubr.msk.bf16.mxu0 %vm438_vm0, %v437_v0  ;;  %v58_v3 = vld [vmem:[#allocation2] sm:$0xff]  ;;  %v326_v4 = vld [vmem:[#allocation7] sm:$0xff]   ;;  %vm81_vm1 = vcmask 261120   ;;  %v328_v7 = vld [vmem:[#allocation7 + $0x10] sm:$0xff]   ;;  %s439_s28 = smov [#allocation8]   ;;  %vm245_vm2 = vcmask 64512  }
  0x38   :  { %296 = vmatprep.subr.bf16.mxu1 %v437_v0  ;;  %312 = vmatprep.mubr.msk.bf16.mxu1 %vm438_vm0, %v437_v0  ;;  %v59_v5 = vpack.c.bf16 %v58_v3, %v58_v3  ;;  %v327_v6 = vld [vmem:[#allocation7 + $0x8] sm:$0xff]   ;;  %v329_v8 = vld [vmem:[#allocation7 + $0x18] sm:$0xff]   ;;  %v330_v9 = vld [vmem:[#allocation7 + $0x20] sm:$0xff]   ;;  %s253_s29 = sshll.u32 %s439_s28, 4  ;;  %s254_s29 = int_to_ptr.vmem [resolvable:$true] %s253_s29 }
  0x39   :  { %289 = vmatpush3.bf16.msra.mxu0 %v324_v1  ;;  %297 = vmatpush3.bf16.msra.mxu1 %v326_v4  ;;  %v331_v10 = vld [vmem:[#allocation7 + $0x28] sm:$0xff]   ;;  %v332_v11 = vld [vmem:[#allocation7 + $0x30] sm:$0xff]   ;;  %v333_v12 = vld [vmem:[#allocation7 + $0x38] sm:$0xff]   ;;  %p409_p11 = scmp.lt.s32.totalorder %s254_s29, %s254_s29 }
  0x3a   :  { %290 = vmatprep.subr.bf16.mxu0 %v437_v0  ;;  %298 = vmatprep.subr.bf16.mxu1 %v437_v0  ;;  %v263_v13 = vld [vmem:[%s527_s2] ss:$0 sm:$0xff]  ;;  %v267_v21 = vld [vmem:[%s527_s2 + $0x1] ss:$0 sm:$0xff]  ;;  %s404_s2 = scalar_lea.vmem %s254_s29, 128 }
  0x3b   :  { %p405_p10 = scmp.ne.s32.totalorder %s254_s29, %s404_s2  ;;  %p410_p12 = scmp.lt.s32.totalorder %s404_s2, %s404_s2 }
  0x3d   :  { %291 = vmatpush3.bf16.msra.mxu0 %v325_v2  ;;  %299 = vmatpush3.bf16.msra.mxu1 %v327_v6  ;;  %p411_p13 = por %p410_p12, %p409_p11 }
  0x3e   :  { %300 = vmatprep.subr.bf16.mxu1 %v437_v0 }
  0x3f   :  { %p412_p0 = pnand %p411_p13, %p405_p10 }
  0x40   :  { %293 = vmatmul.mubr.msk.bf16.vlgmr.msra.gmra.mrb[0].mxu0 %vm81_vm1, %v59_v5 }
  0x41   :  { %301 = vmatpush3.bf16.msra.mxu1 %v328_v7 }
  0x42   :  { %302 = vmatprep.subr.bf16.mxu1 %v437_v0 }
  0x45   :  { %303 = vmatpush3.bf16.msra.mxu1 %v329_v8 }
  0x46   :  { %304 = vmatprep.subr.bf16.mxu1 %v437_v0 }
  0x49   :  { %305 = vmatpush3.bf16.msra.mxu1 %v330_v9 }
  0x4a   :  { %306 = vmatprep.subr.bf16.mxu1 %v437_v0 }
  0x4d   :  { %307 = vmatpush3.bf16.msra.mxu1 %v331_v10 }
  0x4e   :  { %308 = vmatprep.subr.bf16.mxu1 %v437_v0 }
  0x51   :  { %309 = vmatpush3.bf16.msra.mxu1 %v332_v11 }
  0x52   :  { %310 = vmatprep.subr.bf16.mxu1 %v437_v0 }
  0x55   :  { %311 = vmatpush3.bf16.msra.mxu1 %v333_v12 }
 0x113   :  { %v119_v14 = vpop.f32.mrb[0].mxu0 }
 0x114   :  { %v120_v15 = vadd.f32 %v263_v13, %v119_v14  ;;  %v294_v16 = vpop.f32.mrb[1].mxu0 }
 0x115   :  { %v122_v17 = vpop.f32.mrb[2].mxu0 }
 0x116   :  { %v125_v18 = vmax.f32 %v120_v15, 0.0  ;;  %v295_v19 = vpop.f32.mrb[3].mxu0 }
 0x118   :  { %v126_v20 = vpack.c.bf16 %v125_v18, %v125_v18 }
 0x11a   :  { %313 = vmatmul.mubr.bf16.vlgmr.msra.gmra.mrb[0].mxu1 %v126_v20 }
 0x1ed   :  { %v230_v22 = vpop.f32.mrb[0].mxu1 }
 0x1ee   :  { %v231_v23 = vadd.f32 %v267_v21, %v230_v22  ;;  %v314_v24 = vpop.f32.mrb[1].mxu1 }
 0x1ef   :  { %v233_v25 = vpop.f32.mrb[2].mxu1 }
 0x1f0   :  { %236 = vmax.xlane.f32.xlu0 %v231_v23  ;;  %v315_v26 = vpop.f32.mrb[3].mxu1 }
 0x27d   :  { %v237_v27 = vpop.xlane.xlu0 %236 }
 0x27e   :  { %v238_v28 = vsub.f32 %v231_v23, %v237_v27 }
 0x280   :  { %v239_v29 = vmul.f32 1.442695, %v238_v28 }
 0x282   :  { %334 = vpow2.f32 %v239_v29 }
 0x28c   :  { %v335_v30 = vpop.eup %334 }
 0x28d   :  { %241 = vadd.xlane.f32.xlu0 %v335_v30 }
 0x31a   :  { %v242_v31 = vpop.xlane.xlu0 %241 }
 0x31b   :  { %336 = vrcp.f32 %v242_v31 }
 0x325   :  { %v337_v32 = vpop.eup %336 }
 0x326   :  { %v244_v33 = vmul.f32 %v337_v32, %v335_v30 }
 0x328   :  { %246 = vst.msk [vmem:[#allocation8] sm:$0xff] %vm245_vm2, %v244_v33 }
 0x329   :  { %415 = shalt.err (!%p412_p0)
}
 0x32a   :  { %s416_s6 = scalar_lea.hbm %s529_s4, 128 }
 0x32b   :  { %p417_p1 = scmp.ne.s32.totalorder %s529_s4, %s416_s6  ;;  %p420_p2 = scmp.lt.u32.totalorder %s416_s6, %s529_s4 }
 0x32d   :  { %p422_p3 = pnand %p420_p2, %p417_p1 }
 0x32f   :  { %425 = shalt.err (!%p422_p3)
}
 0x330   :  { %256 = dma.vmem_to_hbm [thread:$0]  %s254_s29, 128, %s529_s4, [#allocation4]  }
 0x331   :  { %430 = dma.done.wait [#allocation4], 128  }
 0x332   :  { %431 = vsyncadd [#allocation4], 4294967168 }
 0x333   :  { %260 = vsyncpa [#allocation3], 1 }
 0x334   :  { %261 = vsyncpa [#allocation6], 1 }
 0x335   :  { %262 = vsyncpa [#allocation4], 1 }

</bundles_post_ra>
